<compile_context>
chip_gen: v7x
topology: tpu7x:2x2x1
jax: 0.10.0
libtpu: 0.0.40
codegen_flags: <defaults>
</compile_context>

<pallas_src>
import math

import jax
import jax.numpy as jnp
from jax.experimental import pallas as pl
from jax.experimental.pallas import tpu as pltpu


def _make_pe_table(max_len: int, d_model: int) -> jnp.ndarray:
    """Deterministic PE buffer matching the (non-standard) reference formula:
       pe[pos, c] = sin(pos / 10000**(2c/d))  if c even
                    cos(pos / 10000**(2c/d))  if c odd
    (the reference's cos term uses the odd column's own index in the exponent).
    """
    assert d_model % 2 == 0, "reference init assumes an even d_model"
    pos = jnp.arange(max_len, dtype=jnp.float32)[:, None]          # (L, 1)
    col = jnp.arange(d_model, dtype=jnp.float32)[None, :]          # (1, D)
    denom = jnp.power(jnp.float32(10000.0), 2.0 * col / d_model)   # (1, D)
    angle = pos / denom                                            # (L, D)
    even_mask = (jnp.arange(d_model) % 2 == 0)[None, :]
    pe = jnp.where(even_mask, jnp.sin(angle), jnp.cos(angle))
    return pe.astype(jnp.float32)                                  # (L, D)


_ITEM = 4                           # float32 bytes
_TILE_TARGET = 6 * 1024 * 1024      # ~6 MiB of output per grid step
_LANE_CAP = 64 * 1024               # cap on C when factorizing the flat S*D row


def _largest_mult128_divisor(n: int, cap: int) -> int:
    """Largest multiple-of-128 divisor of n that is <= cap (n % 128 == 0)."""
    best, m, top = 128, 128, min(n, cap)
    while m <= top:
        if n % m == 0:
            best = m
        m += 128
    return best


def _pick_seq_tile(R: int, C: int) -> int:
    """Rows of the (R, C) pe view per block.  Must be a multiple of 8 or == R
    (second-to-last block dim rule)."""
    cap = max(1, _TILE_TARGET // (C * _ITEM))
    if cap >= R:
        return R
    cap8 = (cap // 8) * 8
    if cap8 >= 8:
        for t in range(cap8, 7, -8):          # prefer an exact divisor of R
            if R % t == 0:
                return t
        return cap8                            # ragged last pe tile (masked)
    return min(R, 8)                           # slightly exceed target if needed


def _pick_batch_tile(B: int, TR: int, C: int) -> int:
    """Batch rows per block.  Leading block dim -> no alignment constraint;
    prefer an exact divisor of B so no tile is ragged."""
    cap = max(1, _TILE_TARGET // (TR * C * _ITEM))
    if cap >= B:
        return B
    best_div = 1
    for d in range(1, cap + 1):
        if B % d == 0:
            best_div = d
    if 2 * best_div >= cap:                    # divisor close enough to target
        return best_div
    return cap                                 # ragged last tile, fewer steps


def _force_min_two_blocks(B: int, R: int, TB: int, TR: int):
    """Ensure >= 2 grid blocks so both v7x TensorCores get writeback work."""
    if pl.cdiv(R, TR) * pl.cdiv(B, TB) >= 2:
        return TB, TR
    if B > 1:
        return -(-B // 2), TR                  # split the batch axis
    if R >= 16 and TR == R:
        half = ((-(-R // 2)) + 7) // 8 * 8     # multiple of 8
        if half < R:
            return TB, half
    return TB, TR


def _pe_broadcast_kernel(pe_ref, o_ref):
    # pe_ref: (TR, C); o_ref: (TB, TR, C).  Broadcast over the leading batch
    # rows; the store is the only real work and is lane-dense / unmasked for
    # any C that is a multiple of 128.  (Compute is hidden under the write DMA
    # on all generations.)
    o_ref[...] = jnp.broadcast_to(pe_ref[...][None, :, :], o_ref.shape)


def positional_encoding_forward(x: jnp.ndarray, pe_table: jnp.ndarray) -> jnp.ndarray:
    """x: (B, S, D); pe_table: (max_len, D) float32. Returns (B, S, D) float32.

    Matches the PyTorch module: the x * sqrt(d_model) product is discarded by
    the reference, so x is used only for its (B, S) sizes and is never read.
    """
    B, S, D = x.shape
    assert S <= pe_table.shape[0] and D == pe_table.shape[1]
    SD = S * D

    # Lane-dense factorization (R, C) of the flattened (S*D,) pe row.
    if D % 128 == 0:
        R, C = S, D
    elif SD % 128 == 0:
        C = _largest_mult128_divisor(SD, _LANE_CAP)
        R = SD // C
    else:
        R, C = S, D    # odd toy shapes: correct, stores just get lane-masked

    # Tiny plain-JAX glue: slice + row-major reshape of the pe buffer.
    pe_rc = pe_table[:S, :].reshape(R, C).astype(jnp.float32)

    TR = _pick_seq_tile(R, C)
    TB = _pick_batch_tile(B, TR, C)
    TB, TR = _force_min_two_blocks(B, R, TB, TR)
    # pe tiles on the OUTER axis: pe block index is constant across the inner
    # batch steps, so Pallas skips the pe re-DMA between consecutive steps.
    grid = (pl.cdiv(R, TR), pl.cdiv(B, TB))

    # Explicit VMEM budget: double-buffered output tile + double-buffered pe
    # tile (+ margin).  Required on v5e (16 MiB scoped default); comfortably
    # below v7x's 64 MiB physical per-TC VMEM.
    tr_pad = ((TR + 7) // 8) * 8
    vmem_needed = 2 * (TB * tr_pad * C + tr_pad * C) * _ITEM
    vmem_limit = int(min(max(32 << 20, vmem_needed + (4 << 20)), 56 << 20))

    out3 = pl.pallas_call(
        _pe_broadcast_kernel,
        out_shape=jax.ShapeDtypeStruct((B, R, C), jnp.float32),
        grid=grid,
        in_specs=[
            # Block index depends only on the OUTER grid axis (pe residency).
            pl.BlockSpec((TR, C), lambda r, b: (r, 0)),
        ],
        out_specs=pl.BlockSpec((TB, TR, C), lambda r, b: (b, r, 0)),
        compiler_params=pltpu.CompilerParams(
            dimension_semantics=("parallel", "parallel"),
            vmem_limit_bytes=vmem_limit),
        cost_estimate=pl.CostEstimate(
            flops=0,
            transcendentals=0,
            bytes_accessed=B * SD * _ITEM + SD * _ITEM),
    )(pe_rc)

    # (B, R, C) and (B, S, D) are the same row-major buffer: metadata reshape.
    return out3.reshape(B, S, D)


if __name__ == "__main__":
    # Small shapes consistent with the module: batch=2, seq=8, d_model=32.
    B, S, D = 2, 8, 32
    MAX_LEN = 64  # stand-in for max_len=5000 (kept small; formula identical)

    key = jax.random.PRNGKey(0)
    x = jax.random.normal(key, (B, S, D), dtype=jnp.float32)

    pe_table = _make_pe_table(MAX_LEN, D)

    # Spot-check the table against the reference's scalar formula.
    assert abs(float(pe_table[3, 4]) - math.sin(3 / 10000 ** (2 * 4 / D))) < 1e-6
    assert abs(float(pe_table[3, 5]) - math.cos(3 / 10000 ** (2 * 5 / D))) < 1e-6

    out = positional_encoding_forward(x, pe_table)
    out = jax.block_until_ready(out)

    # Pure-JAX reference of the PyTorch forward (pe repeated over batch).
    ref = jnp.broadcast_to(pe_table[:S, :][None, :, :], (B, S, D))
    assert out.shape == (B, S, D) and out.dtype == jnp.float32
    assert jnp.allclose(out, ref, atol=1e-6), "mismatch vs reference"

    print("KERNEL_OK")
</pallas_src>

<mosaic_0001>
module attributes {stable_mosaic.version = 11 : i64} {
  func.func @_pe_broadcast_kernel(%arg0: i32, %arg1: i32, %arg2: memref<1x256xf32, #tpu.memory_space<vmem>>, %arg3: memref<1x1x256xf32, #tpu.memory_space<vmem>>) attributes {dimension_semantics = [#tpu.dimension_semantics<parallel>, #tpu.dimension_semantics<parallel>], iteration_bounds = array<i64: 1, 2>, scalar_prefetch = 0 : i64, scratch_operands = 0 : i64, tpu.core_type = #tpu.core_type<tc>, window_params = [{transform_indices = @transform_0, window_bounds = array<i64: 1, 256>}, {transform_indices = @transform_1, window_bounds = array<i64: 1, 1, 256>}]} {
    %c0 = arith.constant 0 : index
    %c0_0 = arith.constant 0 : index
    %0 = vector.load %arg2[%c0, %c0_0] : memref<1x256xf32, #tpu.memory_space<vmem>>, vector<1x256xf32>
    %1 = vector.shape_cast %0 : vector<1x256xf32> to vector<1x1x256xf32>
    %c0_1 = arith.constant 0 : index
    %c0_2 = arith.constant 0 : index
    %c0_3 = arith.constant 0 : index
    %2 = vector.load %arg3[%c0_1, %c0_2, %c0_3] : memref<1x1x256xf32, #tpu.memory_space<vmem>>, vector<1x1x256xf32>
    tpu.vector_store %arg3[%c0_1, %c0_2, %c0_3], %1 {strides = array<i32>} : memref<1x1x256xf32, #tpu.memory_space<vmem>>, vector<1x1x256xf32>,
    return
  }
  func.func @transform_0(%arg0: i32, %arg1: i32) -> (i32, i32) {
    %c0_i32 = arith.constant 0 : i32
    %c0_i32_0 = arith.constant 0 : i32
    return %arg0, %c0_i32 : i32, i32
  }
  func.func @transform_1(%arg0: i32, %arg1: i32) -> (i32, i32, i32) {
    %c0_i32 = arith.constant 0 : i32
    %c0_i32_0 = arith.constant 0 : i32
    return %arg1, %arg0, %c0_i32 : i32, i32, i32
  }
}

</mosaic_0001>

<bundles_post_ra>
// kernel: tpu_custom_call.1
= control target key start
LH: loop header
LB: loop body
LE: loop exit
PB: predicated region body
PF: predicated region fallthrough
CT: control target
= control target key end

     0   :  { %6 = vsyncpa [#allocation3], 0  ;;  %s573_s0 = inlined_call_operand.hbm [shape: f32[1,256], index: 0, kind: input, shape index: {}]   ;;  %s574_s1 = inlined_call_operand.hbm [shape: f32[2,1,256], index: 1, kind: output, shape index: {}]  }
   0x1   :  { %7 = vsyncpa [#allocation4], 0 }
   0x2   :  { %9 = vsyncpa [#allocation4 + $0x1], 0  ;;  %s428_s6 = smov 0   ;;  %s430_s7 = smov 0  }
   0x3   :  { %s432_s8 = smov 0   ;;  %s434_s9 = smov 0  }
   0x4   :  { %s436_s10 = smov 0   ;;  %s438_s11 = smov 0  }
   0x5 LB: > { %s225_s12 = sadd.s32 4294967295, %s414_s11   ;;  %s226_s13 = sadd.s32 4294967294, %s414_s11   ;;  %s414_s11 = sphi %s438_s11, %s15_s11   ;;  %s410_s10 = sphi %s436_s10, %s592_s10   ;;  %s406_s9 = sphi %s434_s9, %s591_s9   ;;  %s402_s8 = sphi %s432_s8, %s590_s8   ;;  %s398_s7 = sphi %s430_s7, %s589_s7   ;;  %s394_s6 = sphi %s428_s6, %s588_s6  }
   0x6   : > { %s24_s14 = sadd.s32 1, %s410_s10  ;;  %s62_s15 = sadd.s32 1, %s402_s8 }
   0x7   : > { %p25_p0 = scmp.ge.s32.totalorder %s24_s14, 2  ;;  %p72_p1 = scmp.ne.s32.totalorder %s402_s8, %s398_s7 }
   0x8   : > { %p73_p2 = scmp.eq.s32.totalorder %s225_s12, 1  ;;  %p78_p3 = scmp.ne.s32.totalorder %s398_s7, %s394_s6 }
   0x9   : > { %s594_s14 = smov (%p25_p0, %s24_s14), 0  ;;  %p79_p5 = scmp.eq.s32.totalorder %s226_s13, 1 }
   0xa   : > { %p468_p4 = por %p73_p2, %p72_p1  ;;  %s57_s17 = ssub.s32 %s410_s10, %s594_s14 }
   0xb   : > { %p227_p6 = scmp.ge.s32.totalorder %s414_s11, 1  ;;  %p60_p7 = scmp.eq.s32.totalorder %s57_s17, 0 }
   0xc   : > { %s579_s16 = scalar_select %p468_p4, 1, 0 }
   0xd   : > { %p475_p8 = por %p79_p5, %p78_p3  ;;  %p86_p9 = scmp.lt.s32.totalorder %s414_s11, 3 }
   0xe   : > { %s481_s19 = scalar_select %p60_p7, %s402_s8, %s62_s15  }
   0xf   : > { %s580_s18 = scalar_select %p475_p8, 1, 0 }
  0x10   : > { %p483_p10 = pnand %p227_p6, %p86_p9  ;;  %p487_p11 = scmp.eq.s32.totalorder %s225_s12, 0 }
  0x11   : > { %s416_s22 = smov [#allocation2]   ;;  %s304_s27 = scalar_lea.hbm %s573_s0, 32 }
  0x12   : > { %s581_s20 = scalar_select %p483_p10, 1, 0 }
  0x13   : > { %s582_s21 = scalar_select %p487_p11, 1, 0 }
  0x14   : > { %p244_p12 = pneg %p483_p10  ;;  %s102_s23 = sshll.u32 %s416_s22, 4  ;;  %s103_s23 = int_to_ptr.vmem [resolvable:$true] %s102_s23 }
  0x15   : > { %p305_p0 = scmp.ne.s32.totalorder %s573_s0, %s304_s27  ;;  %p311_p5 = scmp.lt.u32.totalorder %s304_s27, %s573_s0 }
  0x16   : > { %p495_p13 = pnand %p487_p11, %p244_p12 }
  0x18   : > { %p306_p1 = pneg %p495_p13 }
  0x1a   : > { %p307_p2 = pnand %p306_p1, %p305_p0 }
  0x1c   : > { %p308_p3 = pneg %p307_p2 }
  0x1e   : > { %p313_p6 = pnand %p311_p5, %p308_p3 }
  0x20   : > { %316 = shalt.err (!%p313_p6)
}
  0x21   : > { %s317_s3 = scalar_lea.vmem %s103_s23, 32  ;;  %p325_p8 = scmp.lt.s32.totalorder %s103_s23, %s103_s23 }
  0x22   : > { %p318_p7 = scmp.ne.s32.totalorder %s103_s23, %s317_s3  ;;  %p326_p4 = scmp.lt.s32.totalorder %s317_s3, %s317_s3 }
  0x24   : > { %p320_p9 = pnand %p318_p7, %p306_p1  ;;  %p327_p11 = por %p326_p4, %p325_p8 }
  0x26   : > { %p321_p12 = pneg %p320_p9 }
  0x28   : > { %p328_p10 = pnand %p327_p11, %p321_p12 }
  0x2a   : > { %331 = shalt.err (!%p328_p10)
}
  0x2b   : > { %247 = dma.hbm_to_vmem [thread:$0]  (!%p495_p13), %s573_s0, 32, %s103_s23, [#allocation3]  }
  0x2c   : > { %p584_p0 = scmp.ne.s32.totalorder %s581_s20, 0 }
  0x2d   : > { %p585_p2 = scmp.ne.s32.totalorder (!%p584_p0), %s582_s21, 0 }
  0x2e   : > { %115 = sbr.rel (%p584_p0) target bundleno = 80 (0x50), region = 24 }
  0x35   : > { %385 = dma.done.wait (%p585_p2), [#allocation3], 32  }
  0x36   : > { %387 = vsyncadd (%p585_p2), [#allocation3], 4294967264  ;;  %s127_s12 = sand.u32 1, %s398_s7   ;;  %v131_v0 = vlaneseq  ;;  %s237_s22 = sshll.u32 %s406_s9, 5  ;;  %v130_v1 = vld [vmem:[#allocation2] sm:$0x3] }
  0x37   : > { %s231_s13 = sshll.u32 %s127_s12, 1  ;;  %s528_s21 = scalar_lea.hbm %s574_s1, %s237_s22 }
  0x38   : > { %s129_s15 = scalar_lea.vmem [#allocation5], %s231_s13  ;;  %vm133_vm0 = vcmp.lt.s32.totalorder %v131_v0, 256  ;;  %s137_s24 = scalar_lea.sflag [#allocation4], %s127_s12 }
  0x39   : > { %s153_s17 = sshll.u32 %s129_s15, 4  ;;  %135 = vst.msk [vmem:[%s129_s15] sm:$0x3] %vm133_vm0, %v130_v1  ;;  %p586_p8 = scmp.ne.s32.totalorder %s579_s16, 0  ;;  %s523_s17 = int_to_ptr.vmem [resolvable:$true] %s153_s17 }
  0x3a   : > { %s332_s25 = scalar_lea.vmem %s523_s17, 32  ;;  %s417_s9 = smov [#allocation5]  }
  0x3b   : > { %p333_p4 = scmp.ne.s32.totalorder %s523_s17, %s332_s25  ;;  %s336_s26 = sshll.u32 %s417_s9, 4  ;;  %s337_s26 = int_to_ptr.vmem [resolvable:$false] %s336_s26 }
  0x3c   : > { %s338_s27 = scalar_lea.vmem %s337_s26, 64  ;;  %p339_p13 = scmp.lt.s32.totalorder %s523_s17, %s337_s26 }
  0x3d   : > { %p334_p10 = pnand %p333_p4, %p586_p8  ;;  %p340_p1 = scmp.lt.s32.totalorder %s338_s27, %s332_s25 }
  0x3f   : > { %p335_p11 = pneg %p334_p10  ;;  %p341_p3 = por %p340_p1, %p339_p13 }
  0x41   : > { %p342_p5 = pnand %p341_p3, %p335_p11 }
  0x43   : > { %345 = shalt.err (!%p342_p5)
}
  0x44   : > { %s346_s28 = scalar_lea.hbm %s528_s21, 32  ;;  %s350_s2 = scalar_lea.hbm %s574_s1, 64 }
  0x45   : > { %p347_p6 = scmp.ne.s32.totalorder %s528_s21, %s346_s28  ;;  %p351_p12 = scmp.lt.u32.totalorder %s528_s21, %s574_s1 }
  0x46   : > { %p352_p0 = scmp.lt.u32.totalorder %s350_s2, %s346_s28  ;;  %p354_p4 = scmp.lt.u32.totalorder %s346_s28, %s528_s21 }
  0x47   : > { %p348_p7 = pnand %p347_p6, %p586_p8 }
  0x48   : > { %p353_p2 = por %p352_p0, %p351_p12 }
  0x49   : > { %p349_p9 = pneg %p348_p7 }
  0x4a   : > { %p355_p10 = por %p354_p4, %p353_p2 }
  0x4c   : > { %p356_p11 = pnand %p355_p10, %p349_p9 }
  0x4e   : > { %359 = shalt.err (!%p356_p11)
}
  0x4f   : > { %242 = dma.vmem_to_hbm [thread:$0]  (%p586_p8), %s523_s17, 32, %s528_s21, %s137_s24  }
  0x50 PF: > { %p254_p13 = scmp.ge.s32.totalorder %s414_s11, 2  ;;  %s165_s5 = sand.u32 1, %s394_s6  }
  0x51   : > { %p587_p1 = scmp.ne.s32.totalorder %s580_s18, 0  ;;  %s166_s12 = scalar_lea.sflag [#allocation4], %s165_s5 }
  0x53   : > { %p249_p3 = pnand %p254_p13, %p587_p1 }
  0x55   : > { %389 = dma.done.wait (!%p249_p3), %s166_s12, 32  }
  0x56   : > { %391 = vsyncadd (!%p249_p3), %s166_s12, 4294967264  ;;  %s15_s11 = sadd.s32 1, %s414_s11   ;;  %s588_s6 = smov %s398_s7 }
  0x57   : > { %p12_p5 = scmp.ge.s32.totalorder %s15_s11, 4   ;;  %s589_s7 = smov %s402_s8 }
  0x58   : > { %s590_s8 = smov %s481_s19  ;;  %s591_s9 = smov %s410_s10 }
  0x59   : > { %s592_s10 = smov %s594_s14  ;;  %14 = sbr.rel (!%p12_p5) target bundleno = 5 (0x5), region = 62 }
  0x60   :  { %171 = vsyncpa [#allocation3], 1 }
  0x61   :  { %173 = vsyncpa [#allocation3 + $0x1], 1 }
  0x62   :  { %174 = vsyncpa [#allocation4], 1 }
  0x63   :  { %176 = vsyncpa [#allocation4 + $0x1], 1 }

</bundles_post_ra>
